<compile_context>
chip_gen: v5e
topology: v5e:2x2
jax: 0.10.0
libtpu: 0.0.40
codegen_flags: <defaults>
</compile_context>

<pallas_src>
import jax
import jax.numpy as jnp
from jax.experimental import pallas as pl
from jax.experimental.pallas import tpu as pltpu

_LANE = 128     # vreg lane width
_SUBLANE = 8    # f32 sublane count


def _ceil_div(a, b):
    return -(-a // b)


def _round_up(n, m):
    return _ceil_div(n, m) * m


def _device_kind():
    try:
        return jax.devices()[0].device_kind.lower()
    except Exception:
        return ""


def _feature_pad_width(D):
    """Lane-dense padded feature width.

    128 everywhere; bumped to a multiple of 256 on v6e/v7x (256-wide MXU) when
    D is large enough that the extra padding is real MXU fill rather than pure
    HBM waste.
    """
    d_pad = _round_up(D, _LANE)
    kind = _device_kind()
    if D > _LANE and d_pad % 256 != 0 and "v5" not in kind:
        d_pad = _round_up(D, 256)
    return d_pad


def _vmem_cap_bytes():
    """Generation-aware scoped-VMEM ceiling with Mosaic-scratch headroom."""
    try:
        phys = int(pltpu.get_tpu_info().vmem_capacity_bytes)
    except Exception:
        kind = _device_kind()
        phys = (64 << 20) if "v7" in kind else (128 << 20)
    return max(phys - (12 << 20), 32 << 20)


def _spec(shape, index_map, *, buffers=None):
    """BlockSpec with optional buffer-count override (falls back cleanly)."""
    if buffers is not None and hasattr(pl, "Buffered"):
        try:
            return pl.BlockSpec(shape, index_map,
                                pipeline_mode=pl.Buffered(buffers))
        except TypeError:
            pass
    return pl.BlockSpec(shape, index_map)


def _residual_block_kernel(x_ref, w1_ref, b1_ref, w2_ref, b2_ref, o_ref,
                           acc_ref):
    j = pl.program_id(1)

    @pl.when(j == 0)
    def _init():
        acc_ref[...] = jnp.zeros_like(acc_ref)

    # fc1 partial: full contraction dim, one block_d-wide slab of hidden units.
    # MXU gets bf16 operands straight from the resident x tile, f32 accumulate.
    h = jnp.dot(x_ref[...].astype(jnp.bfloat16), w1_ref[...],
                preferred_element_type=jnp.float32)
    h = jnp.maximum(h + b1_ref[...], 0.0)          # ReLU
    # Dropout (eval mode -> identity)

    # fc2 partial: this hidden slab's contribution to every output feature.
    acc_ref[...] += jnp.dot(h.astype(jnp.bfloat16), w2_ref[...],
                            preferred_element_type=jnp.float32)

    @pl.when(j == pl.num_programs(1) - 1)
    def _finalize():
        # Residual add re-reads x from VMEM (cheap vld) instead of holding an
        # f32 copy live across both matmuls.
        y = acc_ref[...] + b2_ref[...] + x_ref[...]
        o_ref[...] = jnp.maximum(y, 0.0).astype(o_ref.dtype)


def prepare_residual_block_params(w1, b1, w2, b2, d_pad):
    """One-time host-side prep: transpose, zero-pad, bf16-cast the weights.

    w1/w2 are PyTorch-layout (out_features, in_features); b1/b2 are (D,).
    Call this once and reuse the result across forward calls.
    """
    D = w1.shape[0]
    pad = d_pad - D
    w1t = jnp.pad(jnp.asarray(w1, jnp.float32).T,
                  ((0, pad), (0, pad))).astype(jnp.bfloat16)
    w2t = jnp.pad(jnp.asarray(w2, jnp.float32).T,
                  ((0, pad), (0, pad))).astype(jnp.bfloat16)
    b1r = jnp.pad(jnp.asarray(b1, jnp.float32).reshape(1, D),
                  ((0, 0), (0, pad)))
    b2r = jnp.pad(jnp.asarray(b2, jnp.float32).reshape(1, D),
                  ((0, 0), (0, pad)))
    return w1t, b1r, w2t, b2r


def _choose_tiles(B, d_pad, block_b_req, vmem_cap):
    # Batch tile: multiple of 8 sublanes, padded to a whole number of tiles.
    block_b = min(block_b_req, _round_up(B, _SUBLANE))
    block_b = _round_up(block_b, _SUBLANE)
    # Guarantee grid >= 2 (v7x megacore sharding) when the batch is big enough
    # that one tile would otherwise cover it.
    if B >= 64 and _ceil_div(_round_up(B, _SUBLANE), block_b) == 1:
        block_b = _round_up(_ceil_div(B, 2), _SUBLANE)
    b_pad = _round_up(B, block_b)

    def vmem_need(block_d):
        nbuf_w = 1 if block_d == d_pad else 2
        f32, bf16 = 4, 2
        return (
            2 * 2 * block_b * d_pad * f32              # x + out tiles, 2-buffered
            + 2 * nbuf_w * d_pad * block_d * bf16      # W1^T / W2^T chunks
            + nbuf_w * block_d * f32 + d_pad * f32     # b1 chunk, b2
            + block_b * d_pad * f32                    # f32 accumulator scratch
            + 4 * block_b * max(block_d, _LANE) * f32  # h / bf16-cast temporaries
            + (2 << 20)                                # slack
        )

    # Keep both weights fully resident (single-buffered) when they fit the
    # VMEM budget; otherwise stream block_d-wide chunks along an "arbitrary"
    # reduction axis with double-buffered weight DMAs.
    block_d = d_pad
    while (vmem_need(block_d) > vmem_cap and block_d > _LANE
           and block_d % 2 == 0 and (block_d // 2) % _LANE == 0):
        block_d //= 2
    return block_b, b_pad, block_d, vmem_need(block_d)


def residual_block(x, w1t, b1r, w2t, b2r, *, block_b=256, out_dtype=None):
    """x: (B, D) float32 (unpadded); remaining args from prepare_residual_block_params."""
    x = jnp.asarray(x, jnp.float32)
    B, D = x.shape
    d_pad = w1t.shape[0]
    # TODO(synk): out_dtype=jnp.bfloat16 halves store traffic if the consumer tolerates it.
    out_dtype = out_dtype or x.dtype

    vmem_cap = _vmem_cap_bytes()
    block_b, b_pad, block_d, vmem_need = _choose_tiles(B, d_pad, block_b, vmem_cap)
    n_btiles = b_pad // block_b
    n_chunks = d_pad // block_d
    resident = n_chunks == 1

    x_p = jnp.pad(x, ((0, b_pad - B), (0, d_pad - D)))

    flops = 4 * b_pad * d_pad * d_pad                 # two matmuls, 2 flops/MAC
    bytes_accessed = (
        2 * b_pad * d_pad * 4                          # x in + out
        + 2 * d_pad * d_pad * 2 * (1 if resident else n_btiles)  # weights
        + 2 * d_pad * 4)                               # biases
    vmem_limit = int(min(max(vmem_need, 32 << 20), vmem_cap))

    out_p = pl.pallas_call(
        _residual_block_kernel,
        out_shape=jax.ShapeDtypeStruct((b_pad, d_pad), out_dtype),
        grid_spec=pltpu.PrefetchScalarGridSpec(
            num_scalar_prefetch=0,
            grid=(n_btiles, n_chunks),
            in_specs=[
                pl.BlockSpec((block_b, d_pad), lambda i, j: (i, 0)),       # x tile
                _spec((d_pad, block_d), lambda i, j: (0, j),
                      buffers=1 if resident else None),                    # W1^T
                _spec((1, block_d), lambda i, j: (0, j),
                      buffers=1 if resident else None),                    # b1
                _spec((block_d, d_pad), lambda i, j: (j, 0),
                      buffers=1 if resident else None),                    # W2^T
                _spec((1, d_pad), lambda i, j: (0, 0), buffers=1),         # b2
            ],
            out_specs=pl.BlockSpec((block_b, d_pad), lambda i, j: (i, 0)),
            scratch_shapes=[pltpu.VMEM((block_b, d_pad), jnp.float32)],
        ),
        compiler_params=pltpu.CompilerParams(
            dimension_semantics=("parallel", "arbitrary"),
            vmem_limit_bytes=vmem_limit,
        ),
        cost_estimate=pl.CostEstimate(
            flops=int(flops), transcendentals=0,
            bytes_accessed=int(bytes_accessed)),
    )(x_p, w1t, b1r, w2t, b2r)

    return out_p[:B, :D]


def reference_bf16(x, w1, b1, w2, b2):
    """Matches the kernel's numerics: bf16 MXU operands, f32 accumulation."""
    xb = x.astype(jnp.bfloat16)
    w1b = w1.astype(jnp.bfloat16)
    w2b = w2.astype(jnp.bfloat16)
    h = jnp.dot(xb, w1b.T, preferred_element_type=jnp.float32) + b1
    h = jnp.maximum(h, 0.0)
    y = jnp.dot(h.astype(jnp.bfloat16), w2b.T,
                preferred_element_type=jnp.float32) + b2
    return jnp.maximum(y + x, 0.0)


def reference_f32(x, w1, b1, w2, b2):
    h = jnp.maximum(x @ w1.T + b1, 0.0)
    y = h @ w2.T + b2
    return jnp.maximum(y + x, 0.0)


if __name__ == "__main__":
    key = jax.random.PRNGKey(0)
    B, D = 8, 32  # batch, size

    k_x, k_w1, k_b1, k_w2, k_b2 = jax.random.split(key, 5)
    bound = 1.0 / jnp.sqrt(D)  # PyTorch default Linear init range
    x = jax.random.normal(k_x, (B, D), dtype=jnp.float32)
    w1 = jax.random.uniform(k_w1, (D, D), jnp.float32, -bound, bound)
    b1 = jax.random.uniform(k_b1, (D,), jnp.float32, -bound, bound)
    w2 = jax.random.uniform(k_w2, (D, D), jnp.float32, -bound, bound)
    b2 = jax.random.uniform(k_b2, (D,), jnp.float32, -bound, bound)

    # One-time weight prep (transpose + pad + bf16 cast) hoisted out of the
    # forward path; the forward itself is jitted so pad/slice fuse.
    d_pad = _feature_pad_width(D)
    params = prepare_residual_block_params(w1, b1, w2, b2, d_pad)
    fwd = jax.jit(residual_block)

    out = jax.block_until_ready(fwd(x, *params))
    assert out.shape == (B, D)

    # Exact-numerics check vs a bf16-operand / f32-accumulate reference.
    ref_b = reference_bf16(x, w1, b1, w2, b2)
    assert jnp.allclose(out, ref_b, atol=1e-3, rtol=1e-3), "mismatch vs bf16 reference"

    # Loose sanity check vs the full-f32 PyTorch semantics.
    ref_f = reference_f32(x, w1, b1, w2, b2)
    assert jnp.allclose(out, ref_f, atol=5e-2, rtol=5e-2), "mismatch vs f32 reference"

    print("KERNEL_OK")
</pallas_src>

<mosaic_0001>
module attributes {stable_mosaic.version = 11 : i64} {
  func.func @_residual_block_kernel(%arg0: i32, %arg1: i32, %arg2: memref<8x128xf32, #tpu.memory_space<vmem>>, %arg3: memref<128x128xbf16, #tpu.memory_space<vmem>>, %arg4: memref<1x128xf32, #tpu.memory_space<vmem>>, %arg5: memref<128x128xbf16, #tpu.memory_space<vmem>>, %arg6: memref<1x128xf32, #tpu.memory_space<vmem>>, %arg7: memref<8x128xf32, #tpu.memory_space<vmem>>, %arg8: memref<8x128xf32, #tpu.memory_space<vmem>>) attributes {dimension_semantics = [#tpu.dimension_semantics<parallel>, #tpu.dimension_semantics<arbitrary>], iteration_bounds = array<i64: 1, 1>, scalar_prefetch = 0 : i64, scratch_operands = 1 : i64, tpu.core_type = #tpu.core_type<tc>, window_params = [{transform_indices = @transform_0, window_bounds = array<i64: 8, 128>}, {pipeline_mode = #tpu.pipeline_mode<synchronous>, transform_indices = @transform_1, window_bounds = array<i64: 128, 128>}, {pipeline_mode = #tpu.pipeline_mode<synchronous>, transform_indices = @transform_2, window_bounds = array<i64: 1, 128>}, {pipeline_mode = #tpu.pipeline_mode<synchronous>, transform_indices = @transform_3, window_bounds = array<i64: 128, 128>}, {pipeline_mode = #tpu.pipeline_mode<synchronous>, transform_indices = @transform_4, window_bounds = array<i64: 1, 128>}, {transform_indices = @transform_5, window_bounds = array<i64: 8, 128>}]} {
    %c0_i32 = arith.constant 0 : i32
    %0 = arith.cmpi eq, %arg1, %c0_i32 : i32
    %1 = arith.extui %0 : i1 to i32
    %c0_i32_0 = arith.constant 0 : i32
    %2 = arith.cmpi ne, %1, %c0_i32_0 : i32
    scf.if %2 {
      %cst_16 = arith.constant 0.000000e+00 : f32
      %21 = vector.broadcast %cst_16 : f32 to vector<8x128xf32>
      %c0_17 = arith.constant 0 : index
      %c0_18 = arith.constant 0 : index
      %22 = vector.load %arg8[%c0_17, %c0_18] : memref<8x128xf32, #tpu.memory_space<vmem>>, vector<8x128xf32>
      tpu.vector_store %arg8[%c0_17, %c0_18], %21 {strides = array<i32>} : memref<8x128xf32, #tpu.memory_space<vmem>>, vector<8x128xf32>,
    } else {
    }
    %c0 = arith.constant 0 : index
    %c0_1 = arith.constant 0 : index
    %3 = vector.load %arg2[%c0, %c0_1] : memref<8x128xf32, #tpu.memory_space<vmem>>, vector<8x128xf32>
    %4 = arith.truncf %3 : vector<8x128xf32> to vector<8x128xbf16>
    %c0_2 = arith.constant 0 : index
    %c0_3 = arith.constant 0 : index
    %5 = vector.load %arg3[%c0_2, %c0_3] : memref<128x128xbf16, #tpu.memory_space<vmem>>, vector<128x128xbf16>
    %cst = arith.constant dense<0.000000e+00> : vector<8x128xf32>
    %6 = tpu.matmul %4, %5, %cst {dimension_numbers = #tpu.dot_dimension_numbers<[1], [0], [0], [1], [0, 0, 1, 1], [], []>} : vector<8x128xbf16>, vector<128x128xbf16>, vector<8x128xf32> -> vector<8x128xf32>
    %c0_4 = arith.constant 0 : index
    %c0_5 = arith.constant 0 : index
    %7 = vector.load %arg4[%c0_4, %c0_5] : memref<1x128xf32, #tpu.memory_space<vmem>>, vector<1x128xf32>
    %8 = vector.broadcast %7 : vector<1x128xf32> to vector<8x128xf32>
    %9 = arith.addf %6, %8 : vector<8x128xf32>
    %cst_6 = arith.constant 0.000000e+00 : f32
    %10 = vector.broadcast %cst_6 : f32 to vector<8x128xf32>
    %11 = arith.maximumf %9, %10 : vector<8x128xf32>
    %c0_7 = arith.constant 0 : index
    %c0_8 = arith.constant 0 : index
    %12 = vector.load %arg8[%c0_7, %c0_8] : memref<8x128xf32, #tpu.memory_space<vmem>>, vector<8x128xf32>
    %13 = arith.truncf %11 : vector<8x128xf32> to vector<8x128xbf16>
    %c0_9 = arith.constant 0 : index
    %c0_10 = arith.constant 0 : index
    %14 = vector.load %arg5[%c0_9, %c0_10] : memref<128x128xbf16, #tpu.memory_space<vmem>>, vector<128x128xbf16>
    %cst_11 = arith.constant dense<0.000000e+00> : vector<8x128xf32>
    %15 = tpu.matmul %13, %14, %cst_11 {dimension_numbers = #tpu.dot_dimension_numbers<[1], [0], [0], [1], [0, 0, 1, 1], [], []>} : vector<8x128xbf16>, vector<128x128xbf16>, vector<8x128xf32> -> vector<8x128xf32>
    %16 = arith.addf %12, %15 : vector<8x128xf32>
    %c0_12 = arith.constant 0 : index
    %c0_13 = arith.constant 0 : index
    %17 = vector.load %arg8[%c0_12, %c0_13] : memref<8x128xf32, #tpu.memory_space<vmem>>, vector<8x128xf32>
    tpu.vector_store %arg8[%c0_12, %c0_13], %16 {strides = array<i32>} : memref<8x128xf32, #tpu.memory_space<vmem>>, vector<8x128xf32>,
    %c0_i32_14 = arith.constant 0 : i32
    %18 = arith.cmpi eq, %arg1, %c0_i32_14 : i32
    %19 = arith.extui %18 : i1 to i32
    %c0_i32_15 = arith.constant 0 : i32
    %20 = arith.cmpi ne, %19, %c0_i32_15 : i32
    scf.if %20 {
      %c0_16 = arith.constant 0 : index
      %c0_17 = arith.constant 0 : index
      %21 = vector.load %arg8[%c0_16, %c0_17] : memref<8x128xf32, #tpu.memory_space<vmem>>, vector<8x128xf32>
      %c0_18 = arith.constant 0 : index
      %c0_19 = arith.constant 0 : index
      %22 = vector.load %arg6[%c0_18, %c0_19] : memref<1x128xf32, #tpu.memory_space<vmem>>, vector<1x128xf32>
      %23 = vector.broadcast %22 : vector<1x128xf32> to vector<8x128xf32>
      %24 = arith.addf %21, %23 : vector<8x128xf32>
      %c0_20 = arith.constant 0 : index
      %c0_21 = arith.constant 0 : index
      %25 = vector.load %arg2[%c0_20, %c0_21] : memref<8x128xf32, #tpu.memory_space<vmem>>, vector<8x128xf32>
      %26 = arith.addf %24, %25 : vector<8x128xf32>
      %cst_22 = arith.constant 0.000000e+00 : f32
      %27 = vector.broadcast %cst_22 : f32 to vector<8x128xf32>
      %28 = arith.maximumf %26, %27 : vector<8x128xf32>
      %c0_23 = arith.constant 0 : index
      %c0_24 = arith.constant 0 : index
      %29 = vector.load %arg7[%c0_23, %c0_24] : memref<8x128xf32, #tpu.memory_space<vmem>>, vector<8x128xf32>
      tpu.vector_store %arg7[%c0_23, %c0_24], %28 {strides = array<i32>} : memref<8x128xf32, #tpu.memory_space<vmem>>, vector<8x128xf32>,
    } else {
    }
    return
  }
  func.func @transform_0(%arg0: i32, %arg1: i32) -> (i32, i32) {
    %c0_i32 = arith.constant 0 : i32
    %c0_i32_0 = arith.constant 0 : i32
    return %arg0, %c0_i32 : i32, i32
  }
  func.func @transform_1(%arg0: i32, %arg1: i32) -> (i32, i32) {
    %c0_i32 = arith.constant 0 : i32
    %c0_i32_0 = arith.constant 0 : i32
    return %c0_i32, %arg1 : i32, i32
  }
  func.func @transform_2(%arg0: i32, %arg1: i32) -> (i32, i32) {
    %c0_i32 = arith.constant 0 : i32
    %c0_i32_0 = arith.constant 0 : i32
    return %c0_i32, %arg1 : i32, i32
  }
  func.func @transform_3(%arg0: i32, %arg1: i32) -> (i32, i32) {
    %c0_i32 = arith.constant 0 : i32
    %c0_i32_0 = arith.constant 0 : i32
    return %arg1, %c0_i32 : i32, i32
  }
  func.func @transform_4(%arg0: i32, %arg1: i32) -> (i32, i32) {
    %c0_i32 = arith.constant 0 : i32
    %c0_i32_0 = arith.constant 0 : i32
    %c0_i32_1 = arith.constant 0 : i32
    return %c0_i32, %c0_i32_0 : i32, i32
  }
  func.func @transform_5(%arg0: i32, %arg1: i32) -> (i32, i32) {
    %c0_i32 = arith.constant 0 : i32
    %c0_i32_0 = arith.constant 0 : i32
    return %arg0, %c0_i32 : i32, i32
  }
}

</mosaic_0001>

<bundles_post_ra>
// kernel: residual_block.1
= control target key start
LH: loop header
LB: loop body
LE: loop exit
PB: predicated region body
PF: predicated region fallthrough
CT: control target
= control target key end

     0   :  { %10 = vsyncpa [#allocation4], 0  ;;  %s472_s0 = inlined_call_operand.vmem [shape: f32[8,128], index: 0, kind: input, shape index: {}]   ;;  %s473_s1 = inlined_call_operand.hbm [shape: bf16[128,128], index: 1, kind: input, shape index: {}]   ;;  %s474_s2 = inlined_call_operand.vmem [shape: f32[1,128], index: 2, kind: input, shape index: {}]   ;;  %s475_s3 = inlined_call_operand.hbm [shape: bf16[128,128], index: 3, kind: input, shape index: {}]   ;;  %s476_s4 = inlined_call_operand.vmem [shape: f32[1,128], index: 4, kind: input, shape index: {}]   ;;  %s477_s5 = inlined_call_operand.hbm [shape: f32[8,128], index: 5, kind: output, shape index: {}]  }
   0x1   :  { %11 = vsyncpa [#allocation7], 0 }
   0x2   :  { %12 = vsyncpa [#allocation5], 0  ;;  %s19_s20 = sshll.u32 %s473_s1, 4  ;;  %s419_s21 = smov [#allocation3]   ;;  %s20_s20 = int_to_ptr.hbm [resolvable:$true] %s19_s20 }
   0x3   :  { %s21_s22 = sshll.u32 %s419_s21, 4  ;;  %s34_s25 = sshll.u32 %s475_s3, 4  ;;  %s22_s22 = int_to_ptr.vmem [resolvable:$true] %s21_s22  ;;  %s35_s25 = int_to_ptr.hbm [resolvable:$true] %s34_s25 }
   0x4   :  { %s420_s26 = smov 64   ;;  %s421_s27 = smov 4  }
   0x5   :  { %27 = dma.hbm_to_vmem [thread:$0]  %s20_s20, 1024, %s22_s22, [#allocation4], %s420_s26, %s420_s26, %s421_s27  }
   0x6   :  { %s422_s28 = smov [#allocation6]  }
   0x7   :  { %s36_s29 = sshll.u32 %s422_s28, 4  ;;  %s37_s29 = int_to_ptr.vmem [resolvable:$true] %s36_s29 }
   0x8   :  { %42 = dma.hbm_to_vmem [thread:$0]  %s35_s25, 1024, %s37_s29, [#allocation7], %s420_s26, %s420_s26, %s421_s27  }
   0x9   :  { %413 = dma.done.wait [#allocation4], 1024  }
   0xa   :  { %414 = vsyncadd [#allocation4], 4294966272 }
   0xb   :  { %415 = dma.done.wait [#allocation7], 1024  }
   0xc   :  { %416 = vsyncadd [#allocation7], 4294966272  ;;  %v325_v0 = vld [vmem:[#allocation3 + $0x38] sm:$0xff]  ;;  %v324_v1 = vld [vmem:[#allocation3 + $0x30] sm:$0xff]  ;;  %s243_s12 = sshll.u32 %s477_s5, 4  ;;  %s244_s12 = int_to_ptr.hbm [resolvable:$true] %s243_s12 }
   0xd   :  { %128 = vmatpush.bf16.msra.mxu0 %v325_v0  ;;  %v333_v2 = vld [vmem:[#allocation6 + $0x38] sm:$0xff]  ;;  %v332_v3 = vld [vmem:[#allocation6 + $0x30] sm:$0xff]  ;;  %v323_v4 = vld [vmem:[#allocation3 + $0x28] sm:$0xff] }
   0xe   :  { %208 = vmatpush.bf16.msra.mxu1 %v333_v2  ;;  %v331_v5 = vld [vmem:[#allocation6 + $0x28] sm:$0xff]  ;;  %v322_v6 = vld [vmem:[#allocation3 + $0x20] sm:$0xff]  ;;  %v321_v8 = vld [vmem:[#allocation3 + $0x18] sm:$0xff] }
   0xf   :  { %v330_v7 = vld [vmem:[#allocation6 + $0x20] sm:$0xff]  ;;  %v329_v9 = vld [vmem:[#allocation6 + $0x18] sm:$0xff]  ;;  %v320_v10 = vld [vmem:[#allocation3 + $0x10] sm:$0xff] }
  0x10   :  { %v328_v11 = vld [vmem:[#allocation6 + $0x10] sm:$0xff]  ;;  %v319_v12 = vld [vmem:[#allocation3 + $0x8] sm:$0xff]  ;;  %v318_v13 = vld [vmem:[#allocation3] sm:$0xff] }
  0x11   :  { %129 = vmatpush.bf16.msra.mxu0 %v324_v1  ;;  %v58_v14 = vld [vmem:[%s472_s0] sm:$0xff]  ;;  %v327_v16 = vld [vmem:[#allocation6 + $0x8] sm:$0xff]  ;;  %s423_s0 = smov [#allocation8]  }
  0x12   :  { %209 = vmatpush.bf16.msra.mxu1 %v332_v3  ;;  %v59_v15 = vpack.c.bf16 %v58_v14, %v58_v14  ;;  %v326_v17 = vld [vmem:[#allocation6] sm:$0xff]  ;;  %s241_s9 = sshll.u32 %s423_s0, 4  ;;  %s242_s9 = int_to_ptr.vmem [resolvable:$true] %s241_s9 }
  0x13   :  { %v339_v18 = vld [vmem:[%s474_s2] ss:$0 sm:$0xff] }
  0x14   :  { %v340_v24 = vld [vmem:[%s476_s4] ss:$0 sm:$0xff] }
  0x15   :  { %130 = vmatpush.bf16.msra.mxu0 %v323_v4 }
  0x16   :  { %210 = vmatpush.bf16.msra.mxu1 %v331_v5 }
  0x19   :  { %131 = vmatpush.bf16.msra.mxu0 %v322_v6 }
  0x1a   :  { %211 = vmatpush.bf16.msra.mxu1 %v330_v7 }
  0x1d   :  { %132 = vmatpush.bf16.msra.mxu0 %v321_v8 }
  0x1e   :  { %212 = vmatpush.bf16.msra.mxu1 %v329_v9 }
  0x21   :  { %133 = vmatpush.bf16.msra.mxu0 %v320_v10 }
  0x22   :  { %213 = vmatpush.bf16.msra.mxu1 %v328_v11 }
  0x25   :  { %134 = vmatpush.bf16.msra.mxu0 %v319_v12 }
  0x26   :  { %214 = vmatpush.bf16.msra.mxu1 %v327_v16 }
  0x29   :  { %135 = vmatpush.bf16.msra.mxu0 %v318_v13 }
  0x2a   :  { %215 = vmatpush.bf16.msra.mxu1 %v326_v17 }
  0x2c   :  { %136 = vmatmul.bf16.vlgmr.msra.gmra.mxu0 %v59_v15 }
  0xa9   :  { %v137_v19 = vpop.f32.mrf.mxu0 }
  0xaa   :  { %v138_v20 = vadd.f32 %v339_v18, %v137_v19 }
  0xac   :  { %v141_v21 = vmax.f32 %v138_v20, 0.0 }
  0xae   :  { %v143_v22 = vpack.c.bf16 %v141_v21, %v141_v21 }
  0xb0   :  { %216 = vmatmul.bf16.vlgmr.msra.gmra.mxu1 %v143_v22 }
  0xb1   :  { %v139_v23 = vpop.f32.mrf.mxu0 }
 0x12d   :  { %v217_v25 = vpop.f32.mrf.mxu1 }
 0x12e   :  { %v231_v26 = vadd.f32 %v340_v24, %v217_v25 }
 0x130   :  { %v233_v27 = vadd.f32 %v231_v26, %v58_v14 }
 0x132   :  { %v234_v28 = vmax.f32 %v233_v27, 0.0 }
 0x134   :  { %235 = vst [vmem:[#allocation8] sm:$0xff] %v234_v28 }
 0x135   :  { %v219_v29 = vpop.f32.mrf.mxu1  ;;  %246 = dma.vmem_to_hbm [thread:$0]  %s242_s9, 128, %s244_s12, [#allocation5]  }
 0x136   :  { %417 = dma.done.wait [#allocation5], 128  }
 0x137   :  { %418 = vsyncadd [#allocation5], 4294967168 }
 0x138   :  { %251 = vsyncpa [#allocation4], 1 }
 0x139   :  { %252 = vsyncpa [#allocation7], 1 }
 0x13a   :  { %253 = vsyncpa [#allocation5], 1 }

</bundles_post_ra>
